<compile_context>
chip_gen: v6e
topology: v6e:2x2x1
jax: 0.10.0
libtpu: 0.0.40
codegen_flags: <defaults>
</compile_context>

<pallas_src>
import functools

import jax
import jax.numpy as jnp
from jax.experimental import pallas as pl
from jax.experimental.pallas import tpu as pltpu


# ------------------------------ Pallas kernel -------------------------------

def _gemm_bias_relu_kernel(cols_ref, w_ref, bias_ref, o_ref, *, apply_relu):
    # cols_ref: (Kdim, TN)   channel-major im2col columns (one image, one tile)
    # w_ref:    (Cout, Kdim) conv weights with the BN scale folded in
    # bias_ref: (Cout, 1)    folded BN (+ conv) bias
    # o_ref:    (Cout, TN)   lane-dense output (pixel dim on the lane axis)
    acc = jnp.dot(w_ref[...], cols_ref[...], preferred_element_type=jnp.float32)
    y = acc + bias_ref[...]
    if apply_relu:
        y = jnp.maximum(y, 0.0)
    o_ref[...] = y.astype(o_ref.dtype)


# ----------------------------- host-side wrapper ----------------------------

def _fold_bn(params, cout, dtype, bn, eps):
    """Fold eval-mode BatchNorm (+ optional conv bias) into (scale, bias)."""
    b_conv = params.get("b", None)
    if bn:
        bnp = params["bn"]
        scale = bnp["gamma"] / jnp.sqrt(bnp["var"] + eps)
        bias = bnp["beta"] - bnp["mean"] * scale
        if b_conv is not None:
            bias = bias + b_conv * scale
    else:
        scale = jnp.ones((cout,), dtype)
        bias = b_conv if b_conv is not None else jnp.zeros((cout,), dtype)
    return scale, bias


def basic_conv(x_nchw, params, *, stride=1, padding=0, dilation=1, groups=1,
               relu=True, bn=True, eps=1e-5):
    """Forward pass of BasicConv: Conv2d + BatchNorm2d(eval) + ReLU. NCHW in/out."""
    if groups != 1:
        # TODO(synk): grouped convolution not implemented.
        raise NotImplementedError("groups != 1 is not supported")

    w = params["w"]                                   # (Cout, Cin, Kh, Kw) PyTorch OIHW
    Cout, Cin, Kh, Kw = w.shape
    B, Cin_x, H, W = x_nchw.shape
    assert Cin_x == Cin, (Cin_x, Cin)

    Ho = (H + 2 * padding - dilation * (Kh - 1) - 1) // stride + 1
    Wo = (W + 2 * padding - dilation * (Kw - 1) - 1) // stride + 1
    Npix = Ho * Wo
    Kdim = Cin * Kh * Kw

    # Fold eval-mode BN into a per-channel affine; the scale goes into the weights.
    scale, bias = _fold_bn(params, Cout, w.dtype, bn, eps)
    w2d = w.reshape(Cout, Kdim) * scale[:, None]      # (Cout, Kdim)

    # Channel-major im2col glue (plain JAX): pixels land on the lane axis.
    xp = jnp.pad(x_nchw, ((0, 0), (0, 0), (padding, padding), (padding, padding)))
    taps = []
    for kh in range(Kh):
        for kw in range(Kw):
            h0, w0 = kh * dilation, kw * dilation
            taps.append(xp[:, :,
                           h0:h0 + stride * (Ho - 1) + 1:stride,
                           w0:w0 + stride * (Wo - 1) + 1:stride])
    cols = jnp.stack(taps, axis=2)                    # (B, Cin, Kh*Kw, Ho, Wo)
    cols = cols.reshape(B, Kdim, Npix)                # row order (cin, kh, kw) == w2d cols

    # Lane-align / tile the pixel axis: multiple of 128 -> unmasked stores;
    # cap per-step tile at 2048 lanes so VMEM stays bounded for big images.
    LANE = 128
    TN_MAX = 2048
    npix_pad = ((Npix + LANE - 1) // LANE) * LANE
    TN = min(npix_pad, TN_MAX)
    npix_pad = ((npix_pad + TN - 1) // TN) * TN
    if npix_pad != Npix:
        cols = jnp.pad(cols, ((0, 0), (0, 0), (0, npix_pad - Npix)))
    n_tiles = npix_pad // TN

    kernel = functools.partial(_gemm_bias_relu_kernel, apply_relu=relu)
    out = pl.pallas_call(
        kernel,
        out_shape=jax.ShapeDtypeStruct((B, Cout, npix_pad), x_nchw.dtype),
        grid=(B, n_tiles),
        in_specs=[
            pl.BlockSpec((None, Kdim, TN), lambda b, n: (b, 0, n)),
            pl.BlockSpec((Cout, Kdim), lambda b, n: (0, 0)),
            pl.BlockSpec((Cout, 1), lambda b, n: (0, 0)),
        ],
        out_specs=pl.BlockSpec((None, Cout, TN), lambda b, n: (b, 0, n)),
        compiler_params=pltpu.CompilerParams(
            dimension_semantics=("parallel", "parallel")),
    )(cols, w2d, bias.reshape(Cout, 1))

    if npix_pad != Npix:
        out = out[:, :, :Npix]
    # Channel-major kernel output reshapes straight to NCHW: no transposes anywhere.
    return out.reshape(B, Cout, Ho, Wo)


# ------------------------------- pure-JAX ref --------------------------------

def basic_conv_ref(x_nchw, params, *, stride=1, padding=0, dilation=1, groups=1,
                   relu=True, bn=True, eps=1e-5):
    w = params["w"]
    y = jax.lax.conv_general_dilated(
        x_nchw, w, window_strides=(stride, stride),
        padding=[(padding, padding)] * 2,
        rhs_dilation=(dilation, dilation),
        dimension_numbers=("NCHW", "OIHW", "NCHW"),
        feature_group_count=groups,
        precision=jax.lax.Precision.HIGHEST)
    scale, bias = _fold_bn(params, w.shape[0], w.dtype, bn, eps)
    y = y * scale[None, :, None, None] + bias[None, :, None, None]
    if relu:
        y = jnp.maximum(y, 0.0)
    return y


# ----------------------------------- main ------------------------------------

if __name__ == "__main__":
    key = jax.random.PRNGKey(0)
    k_x, k_w, k_g, k_b, k_m, k_v, k_w2 = jax.random.split(key, 7)

    # BasicConv(in_planes=4, out_planes=32, kernel_size=3, padding=1) defaults:
    # stride=1, dilation=1, groups=1, relu=True, bn=True, bias=False.
    B, Cin, H, W = 2, 4, 16, 16
    Cout, K, stride, padding = 32, 3, 1, 1

    x = jax.random.normal(k_x, (B, Cin, H, W), jnp.float32)
    params = {
        "w": jax.random.normal(k_w, (Cout, Cin, K, K), jnp.float32) * 0.1,
        "b": None,                                    # bias=False
        "bn": {
            "gamma": jax.random.uniform(k_g, (Cout,), jnp.float32, minval=0.5, maxval=1.5),
            "beta": jax.random.normal(k_b, (Cout,), jnp.float32) * 0.1,
            "mean": jax.random.normal(k_m, (Cout,), jnp.float32) * 0.1,
            "var": jax.random.uniform(k_v, (Cout,), jnp.float32, minval=0.5, maxval=1.5),
        },
    }

    fwd = jax.jit(functools.partial(basic_conv, stride=stride, padding=padding,
                                    dilation=1, groups=1, relu=True, bn=True))
    out = jax.block_until_ready(fwd(x, params))
    assert out.shape == (B, Cout, H, W), out.shape

    ref = jax.block_until_ready(
        basic_conv_ref(x, params, stride=stride, padding=padding,
                       dilation=1, groups=1, relu=True, bn=True))
    assert jnp.allclose(out, ref, atol=1e-4, rtol=1e-4), \
        float(jnp.max(jnp.abs(out - ref)))

    # Second config: BasicConv(kernel_size=1, padding=0) — exercises the K=1 path.
    Cout1 = 16
    params1 = {
        "w": jax.random.normal(k_w2, (Cout1, Cin, 1, 1), jnp.float32) * 0.1,
        "b": None,
        "bn": {
            "gamma": jnp.ones((Cout1,), jnp.float32),
            "beta": jnp.zeros((Cout1,), jnp.float32),
            "mean": jnp.zeros((Cout1,), jnp.float32),
            "var": jnp.ones((Cout1,), jnp.float32),
        },
    }
    fwd1 = jax.jit(functools.partial(basic_conv, stride=1, padding=0,
                                     dilation=1, groups=1, relu=True, bn=True))
    out1 = jax.block_until_ready(fwd1(x, params1))
    ref1 = jax.block_until_ready(basic_conv_ref(x, params1, stride=1, padding=0))
    assert out1.shape == (B, Cout1, H, W), out1.shape
    assert jnp.allclose(out1, ref1, atol=1e-4, rtol=1e-4), \
        float(jnp.max(jnp.abs(out1 - ref1)))

    print("KERNEL_OK")
</pallas_src>

<mosaic_0001>
module attributes {stable_mosaic.version = 11 : i64} {
  func.func @_gemm_bias_relu_kernel(%arg0: i32, %arg1: i32, %arg2: memref<1x36x256xf32, #tpu.memory_space<vmem>>, %arg3: memref<32x36xf32, #tpu.memory_space<vmem>>, %arg4: memref<32x1xf32, #tpu.memory_space<vmem>>, %arg5: memref<1x32x256xf32, #tpu.memory_space<vmem>>) attributes {dimension_semantics = [#tpu.dimension_semantics<parallel>, #tpu.dimension_semantics<parallel>], iteration_bounds = array<i64: 2, 1>, scalar_prefetch = 0 : i64, scratch_operands = 0 : i64, tpu.core_type = #tpu.core_type<tc>, window_params = [{transform_indices = @transform_0, window_bounds = array<i64: 1, 36, 256>}, {pipeline_mode = #tpu.pipeline_mode<synchronous>, transform_indices = @transform_1, window_bounds = array<i64: 32, 36>}, {pipeline_mode = #tpu.pipeline_mode<synchronous>, transform_indices = @transform_2, window_bounds = array<i64: 32, 1>}, {transform_indices = @transform_3, window_bounds = array<i64: 1, 32, 256>}]} {
    %c0 = arith.constant 0 : index
    %c0_0 = arith.constant 0 : index
    %0 = vector.load %arg3[%c0, %c0_0] : memref<32x36xf32, #tpu.memory_space<vmem>>, vector<32x36xf32>
    %c0_1 = arith.constant 0 : index
    %c0_2 = arith.constant 0 : index
    %c0_3 = arith.constant 0 : index
    %1 = vector.load %arg2[%c0_1, %c0_2, %c0_3] : memref<1x36x256xf32, #tpu.memory_space<vmem>>, vector<1x36x256xf32>
    %2 = vector.shape_cast %1 : vector<1x36x256xf32> to vector<36x256xf32>
    %cst = arith.constant dense<0.000000e+00> : vector<32x256xf32>
    %3 = tpu.matmul %0, %2, %cst {dimension_numbers = #tpu.dot_dimension_numbers<[1], [0], [0], [1], [0, 0, 1, 1], [], []>} : vector<32x36xf32>, vector<36x256xf32>, vector<32x256xf32> -> vector<32x256xf32>
    %c0_4 = arith.constant 0 : index
    %c0_5 = arith.constant 0 : index
    %4 = vector.load %arg4[%c0_4, %c0_5] : memref<32x1xf32, #tpu.memory_space<vmem>>, vector<32x1xf32>
    %5 = vector.broadcast %4 : vector<32x1xf32> to vector<32x256xf32>
    %6 = arith.addf %3, %5 : vector<32x256xf32>
    %cst_6 = arith.constant 0.000000e+00 : f32
    %7 = vector.broadcast %cst_6 : f32 to vector<32x256xf32>
    %8 = arith.maximumf %6, %7 : vector<32x256xf32>
    %c0_7 = arith.constant 0 : index
    %c0_8 = arith.constant 0 : index
    %c0_9 = arith.constant 0 : index
    %9 = vector.load %arg5[%c0_7, %c0_8, %c0_9] : memref<1x32x256xf32, #tpu.memory_space<vmem>>, vector<1x32x256xf32>
    %10 = vector.shape_cast %9 : vector<1x32x256xf32> to vector<32x256xf32>
    %11 = vector.shape_cast %8 : vector<32x256xf32> to vector<1x32x256xf32>
    tpu.vector_store %arg5[%c0_7, %c0_8, %c0_9], %11 {strides = array<i32>} : memref<1x32x256xf32, #tpu.memory_space<vmem>>, vector<1x32x256xf32>,
    return
  }
  func.func @transform_0(%arg0: i32, %arg1: i32) -> (i32, i32, i32) {
    %c0_i32 = arith.constant 0 : i32
    %c0_i32_0 = arith.constant 0 : i32
    return %arg0, %c0_i32, %arg1 : i32, i32, i32
  }
  func.func @transform_1(%arg0: i32, %arg1: i32) -> (i32, i32) {
    %c0_i32 = arith.constant 0 : i32
    %c0_i32_0 = arith.constant 0 : i32
    %c0_i32_1 = arith.constant 0 : i32
    return %c0_i32, %c0_i32_0 : i32, i32
  }
  func.func @transform_2(%arg0: i32, %arg1: i32) -> (i32, i32) {
    %c0_i32 = arith.constant 0 : i32
    %c0_i32_0 = arith.constant 0 : i32
    %c0_i32_1 = arith.constant 0 : i32
    return %c0_i32, %c0_i32_0 : i32, i32
  }
  func.func @transform_3(%arg0: i32, %arg1: i32) -> (i32, i32, i32) {
    %c0_i32 = arith.constant 0 : i32
    %c0_i32_0 = arith.constant 0 : i32
    return %arg0, %c0_i32, %arg1 : i32, i32, i32
  }
}

</mosaic_0001>

<bundles_post_ra>
// kernel: basic_conv.1
= control target key start
LH: loop header
LB: loop body
LE: loop exit
PB: predicated region body
PF: predicated region fallthrough
CT: control target
= control target key end

     0   :  { %s562_s12 = smov 0   ;;  %s564_s13 = smov 0   ;;  %s623_s0 = inlined_call_operand.vmem [shape: f32[2,36,256], index: 0, kind: input, shape index: {}]   ;;  %s624_s1 = inlined_call_operand.vmem [shape: f32[32,36], index: 1, kind: input, shape index: {}]   ;;  %s625_s2 = inlined_call_operand.vmem [shape: f32[32,1], index: 2, kind: input, shape index: {}]   ;;  %s626_s3 = inlined_call_operand.vmem [shape: f32[2,32,256], index: 3, kind: output, shape index: {}]  }
   0x1   :  { %s566_s14 = smov 0  }
   0x2 LB: > { %s25_s15 = sadd.s32 1, %s534_s13  ;;  %p464_p0 = scmp.ge.s32.totalorder %s538_s14, 1  ;;  %s538_s14 = sphi %s566_s14, %s13_s14   ;;  %s534_s13 = sphi %s564_s13, %s628_s13   ;;  %s530_s12 = sphi %s562_s12, %s627_s12  }
   0x3   : > { %p27_p1 = scmp.ge.s32.totalorder %s25_s15, 2  ;;  %p158_p2 = scmp.lt.s32.totalorder %s538_s14, 3 }
   0x5   : > { %s630_s15 = smov (%p27_p1, %s25_s15), 0  ;;  %p159_p3 = pnand %p464_p0, %p158_p2 }
   0x6   : > { %p191_p4 = scmp.lt.s32.totalorder (!%p159_p3), %s530_s12, 1 }
   0x7   : > { %162 = sbr.rel (%p159_p3) target bundleno = 232 (0xe8), region = 32 }
   0xc   : > { %v540_v0 = vmov 0.0   ;;  %v226_v1 = vld [vmem:[%s625_s2 + $0x10] sm:$0xff]  ;;  %s632_s12 = smov (!%p191_p4, %s530_s12), 1  ;;  %v541_v2 = vmov 0   ;;  %v224_v3 = vld [vmem:[%s625_s2] sm:$0xff]  ;;  %v227_v4 = vld [vmem:[%s625_s2 + $0x18] sm:$0xff] }
   0xd   : > { %332 = vmatprep.mubr.f32.mxu0 %v540_v0  ;;  %344 = vmatprep.mubr.f32.mxu1 %v540_v0  ;;  %s487_s20 = smul.u32 80, %s632_s12  ;;  %v225_v5 = vld [vmem:[%s625_s2 + $0x8] sm:$0xff]  ;;  %vm261_vm0 = vcmask 1043456   ;;  %v210_v16 = vld [vmem:[%s624_s1] sm:$0xff]  ;;  %vm248_vm1 = vcmask 293888   ;;  %v212_v17 = vld [vmem:[%s624_s1 + $0x10] sm:$0xff] }
   0xe   : > { %515 = vset.pattern.permute.xlu1 %v541_v2  ;;  %514 = vset.pattern.permute.xlu0 %v541_v2  ;;  %v211_v18 = vld [vmem:[%s624_s1 + $0x8] sm:$0xff]  ;;  %v213_v19 = vld [vmem:[%s624_s1 + $0x18] sm:$0xff]  ;;  %s476_s9 = sshll.u32 %s632_s12, 6 }
   0xf   : > { %240 = vperm.xlu1 %515, %v226_v1   ;;  %230 = vperm.xlu0 %514, %v224_v3   ;;  %s198_s27 = scalar_lea.vmem %s623_s0, %s487_s20  ;;  %s208_s16 = scalar_lea.vmem %s626_s3, %s476_s9 }
  0x10   : > { %v223_v6 = vld [vmem:[%s198_s27 + $0x48] sm:$0xf]  ;;  %v222_v7 = vld [vmem:[%s198_s27 + $0x40] sm:$0xf]  ;;  %v221_v8 = vld [vmem:[%s198_s27 + $0x38] sm:$0xff] }
  0x11   : > { %468 = vmatprep.subr.msk.mxu0 %vm261_vm0, %v223_v6  ;;  %477 = vmatprep.subr.msk.mxu1 %vm261_vm0, %v223_v6  ;;  %v220_v9 = vld [vmem:[%s198_s27 + $0x30] sm:$0xff]  ;;  %v219_v10 = vld [vmem:[%s198_s27 + $0x28] sm:$0xff]  ;;  %v218_v11 = vld [vmem:[%s198_s27 + $0x20] sm:$0xff] }
  0x12   : > { %469 = vmatpush1.msk.msra.mxu0 %vm261_vm0, %v222_v7  ;;  %482 = vmatpush1.msk.msra.mxu1 %vm261_vm0, %v222_v7  ;;  %v217_v12 = vld [vmem:[%s198_s27 + $0x18] sm:$0xff]  ;;  %v216_v13 = vld [vmem:[%s198_s27 + $0x10] sm:$0xff]  ;;  %v215_v14 = vld [vmem:[%s198_s27 + $0x8] sm:$0xff] }
  0x13   : > { %245 = vperm.xlu1 %515, %v227_v4   ;;  %235 = vperm.xlu0 %514, %v225_v5   ;;  %v214_v15 = vld [vmem:[%s198_s27] sm:$0xff] }
  0x14   : > { %292 = vmatprep.subr.mxu0 %v221_v8  ;;  %478 = vmatprep.subr.mxu1 %v221_v8 }
  0x15   : > { %293 = vmatpush1.msra.mxu0 %v220_v9  ;;  %483 = vmatpush1.msra.mxu1 %v220_v9 }
  0x16   : > { %294 = vmatprep.subr.mxu0 %v219_v10  ;;  %479 = vmatprep.subr.mxu1 %v219_v10 }
  0x17   : > { %295 = vmatpush1.msra.mxu0 %v218_v11  ;;  %484 = vmatpush1.msra.mxu1 %v218_v11 }
  0x18   : > { %296 = vmatprep.subr.mxu0 %v217_v12  ;;  %480 = vmatprep.subr.mxu1 %v217_v12 }
  0x19   : > { %297 = vmatpush1.msra.mxu0 %v216_v13  ;;  %485 = vmatpush1.msra.mxu1 %v216_v13 }
  0x1a   : > { %298 = vmatprep.subr.mxu0 %v215_v14  ;;  %481 = vmatprep.subr.mxu1 %v215_v14 }
  0x1b   : > { %299 = vmatpush1.msra.mxu0 %v214_v15  ;;  %486 = vmatpush1.msra.mxu1 %v214_v15 }
  0x1c   : > { %470 = vmatmul.mubr.msk.f32.vlgmr.msra.gmra.mxu0 %vm248_vm1, %v210_v16  ;;  %472 = vmatmul.mubr.msk.f32.vlgmr.msra.gmra.mxu1 %vm248_vm1, %v212_v17 }
  0x1d   : > { %338 = vmatprep.mubr.f32.mxu0 %v540_v0  ;;  %350 = vmatprep.mubr.f32.mxu1 %v540_v0 }
  0x20   : > { %471 = vmatmul.mubr.msk.f32.gmra.mxu0 %vm248_vm1, %v211_v18  ;;  %473 = vmatmul.mubr.msk.f32.gmra.mxu1 %vm248_vm1, %v213_v19 }
  0x8a   : > { %v241_v20 = vpop.permute.xlu1 %240  ;;  %v231_v21 = vpop.permute.xlu0 %230 }
  0x8e   : > { %v246_v30 = vpop.permute.xlu1 %245  ;;  %v236_v31 = vpop.permute.xlu0 %235 }
  0xdc   : > { %v334_v22 = vpop.f32.mrf.mxu0  ;;  %v346_v23 = vpop.f32.mrf.mxu1 }
  0xdd   : > { %v335_v24 = vadd.f32 %v334_v22, %v231_v21  ;;  %v347_v25 = vadd.f32 %v346_v23, %v241_v20 }
  0xde   : > { %v336_v26 = vpop.f32.mrf.mxu0  ;;  %v348_v27 = vpop.f32.mrf.mxu1 }
  0xdf   : > { %v357_v28 = vmax.f32 %v335_v24, 0.0  ;;  %v361_v29 = vmax.f32 %v347_v25, 0.0  ;;  %v337_v32 = vadd.f32 %v336_v26, %v231_v21  ;;  %v349_v33 = vadd.f32 %v348_v27, %v241_v20 }
  0xe0   : > { %v340_v34 = vpop.f32.mrf.mxu0  ;;  %v352_v35 = vpop.f32.mrf.mxu1 }
  0xe1   : > { %365 = vst [vmem:[%s208_s16] sm:$0xff] %v357_v28  ;;  %369 = vst [vmem:[%s208_s16 + $0x20] sm:$0xff] %v361_v29  ;;  %v358_v36 = vmax.f32 %v337_v32, 0.0  ;;  %v362_v37 = vmax.f32 %v349_v33, 0.0  ;;  %v341_v38 = vadd.f32 %v340_v34, %v236_v31  ;;  %v353_v39 = vadd.f32 %v352_v35, %v246_v30 }
  0xe2   : > { %v342_v40 = vpop.f32.mrf.mxu0  ;;  %v354_v41 = vpop.f32.mrf.mxu1 }
  0xe3   : > { %366 = vst [vmem:[%s208_s16 + $0x8] sm:$0xff] %v358_v36  ;;  %370 = vst [vmem:[%s208_s16 + $0x28] sm:$0xff] %v362_v37  ;;  %v359_v42 = vmax.f32 %v341_v38, 0.0  ;;  %v363_v43 = vmax.f32 %v353_v39, 0.0  ;;  %v343_v44 = vadd.f32 %v342_v40, %v236_v31  ;;  %v355_v45 = vadd.f32 %v354_v41, %v246_v30 }
  0xe5   : > { %367 = vst [vmem:[%s208_s16 + $0x10] sm:$0xff] %v359_v42  ;;  %371 = vst [vmem:[%s208_s16 + $0x30] sm:$0xff] %v363_v43  ;;  %v360_v46 = vmax.f32 %v343_v44, 0.0  ;;  %v364_v47 = vmax.f32 %v355_v45, 0.0 }
  0xe7   : > { %368 = vst [vmem:[%s208_s16 + $0x18] sm:$0xff] %v360_v46  ;;  %372 = vst [vmem:[%s208_s16 + $0x38] sm:$0xff] %v364_v47 }
  0xe8 PF: > { %s13_s14 = sadd.s32 1, %s538_s14   ;;  %s627_s12 = smov %s534_s13 }
  0xe9   : > { %p10_p5 = scmp.ge.s32.totalorder %s13_s14, 4   ;;  %s628_s13 = smov %s630_s15 }
  0xeb   :  { %12 = sbr.rel (!%p10_p5) target bundleno = 2 (0x2), region = 62 }

</bundles_post_ra>
